<compile_context>
chip_gen: v5e
topology: v5e:2x2
jax: 0.10.0
libtpu: 0.0.40
codegen_flags: <defaults>
</compile_context>

<pallas_src>
import jax
import jax.numpy as jnp
from jax.experimental import pallas as pl
from jax.experimental.pallas import tpu as pltpu


def _make_kernel(CI):
    """p_ref: (K_pad, HW_pad) VMEM im2col patches (centre tap = first CI rows)
       w_ref: (CO,    K_pad)  VMEM conv weights (column order matches p rows)
       o_ref: (CO,    HW_pad) VMEM relu(conv(x) + x), lane-dense
    """

    def kernel(p_ref, w_ref, o_ref):
        # Single MXU matmul, f32 accumulation (inputs are ~100-scaled).
        conv = jnp.dot(w_ref[...], p_ref[...],
                       preferred_element_type=jnp.float32)        # (CO, HW_pad)
        # Residual: centre-tap rows (unpadded input, flattened). CO == CI so
        # channels line up 1:1; slice starts at sublane 0 (always aligned).
        res = p_ref[:CI, :]                                       # (CI, HW_pad)
        # Fused add + ReLU, one unmasked full-tile lane-dense store.
        o_ref[...] = jnp.maximum(conv + res, 0.0)

    return kernel


def _round_up(n, m):
    return ((n + m - 1) // m) * m


def net_forward(x, w):
    """x: (CI, HI, WI) float32, w: (CO, CI, KER, KER) float32, CO == CI."""
    CI, HI, WI = x.shape
    CO, _, KER, _ = w.shape
    PAD = (KER - 1) // 2
    HW = HI * WI

    # ---- layout prep (glue, outside the kernel) ----
    # Tap order: centre tap first so the residual rows sit at offset 0.
    taps = [(PAD, PAD)] + [(kh, kw)
                           for kh in range(KER) for kw in range(KER)
                           if (kh, kw) != (PAD, PAD)]

    # im2col: (T*CI, HI*WI) patch matrix, row = t*CI + ci.
    xpad = jnp.pad(x, ((0, 0), (PAD, PAD), (PAD, PAD)))
    patches = jnp.stack(
        [xpad[:, kh:kh + HI, kw:kw + WI] for (kh, kw) in taps],
        axis=0,                                # (T, CI, HI, WI)
    ).reshape(KER * KER * CI, HW)

    # weights (CO, CI, KER, KER) -> (CO, T*CI), column order matches patch rows.
    w_mat = jnp.stack([w[:, :, kh, kw] for (kh, kw) in taps],
                      axis=1).reshape(CO, KER * KER * CI)

    # Pad contraction dim to a multiple of 8 (sublanes) and the lane dim to a
    # multiple of 128 -- zero padding is exact for the conv and the ReLU.
    K = KER * KER * CI
    K_pad = _round_up(K, 8)
    HW_pad = _round_up(HW, 128)
    if K_pad != K:
        patches = jnp.pad(patches, ((0, K_pad - K), (0, 0)))
        w_mat = jnp.pad(w_mat, ((0, 0), (0, K_pad - K)))
    if HW_pad != HW:
        patches = jnp.pad(patches, ((0, 0), (0, HW_pad - HW)))

    flops = 2 * CO * K_pad * HW_pad + 2 * CO * HW_pad       # matmul + add/relu
    bytes_accessed = 4 * (patches.size + w_mat.size + CO * HW_pad)

    out = pl.pallas_call(
        _make_kernel(CI),
        out_shape=jax.ShapeDtypeStruct((CO, HW_pad), jnp.float32),
        in_specs=[
            pl.BlockSpec(memory_space=pltpu.MemorySpace.VMEM),   # patches
            pl.BlockSpec(memory_space=pltpu.MemorySpace.VMEM),   # weights
        ],
        out_specs=pl.BlockSpec(memory_space=pltpu.MemorySpace.VMEM),
        cost_estimate=pl.CostEstimate(flops=flops, transcendentals=0,
                                      bytes_accessed=bytes_accessed),
    )(patches, w_mat)

    return out[:, :HW].reshape(CO, HI, WI)


def reference_forward(x, w):
    """Pure-JAX reference: relu(conv2d_same(x, w) + x)."""
    PAD = (w.shape[-1] - 1) // 2
    conv = jax.lax.conv_general_dilated(
        x[None],                 # (1, CI, HI, WI)
        w,                       # (CO, CI, KER, KER)
        window_strides=(1, 1),
        padding=[(PAD, PAD), (PAD, PAD)],
        dimension_numbers=("NCHW", "OIHW", "NCHW"),
    )[0]
    return jnp.maximum(conv + x, 0.0)


if __name__ == "__main__":
    # Small shapes consistent with the module: CI == CO, square "same" conv.
    CI = CO = 4
    KER = 3
    HI = WI = 16

    key = jax.random.PRNGKey(0)
    kx, kw = jax.random.split(key)

    # test_data = 100 * torch.rand(CI, HI, WI)
    x = 100.0 * jax.random.uniform(kx, (CI, HI, WI), dtype=jnp.float32)
    # Conv2d(CI, CO, KER, bias=False) default init: U(-1/sqrt(fan_in), 1/sqrt(fan_in))
    fan_in = CI * KER * KER
    bound = 1.0 / (fan_in ** 0.5)
    w = jax.random.uniform(kw, (CO, CI, KER, KER), dtype=jnp.float32,
                           minval=-bound, maxval=bound)

    out = jax.block_until_ready(net_forward(x, w))

    ref = reference_forward(x, w)
    assert out.shape == (CO, HI, WI)
    assert jnp.allclose(out, ref, atol=1e-3, rtol=1e-3), "mismatch vs reference"

    print("KERNEL_OK")
</pallas_src>

<mosaic_0001>
module attributes {stable_mosaic.version = 11 : i64} {
  func.func @kernel(%arg0: memref<40x256xf32, #tpu.memory_space<vmem>>, %arg1: memref<4x40xf32, #tpu.memory_space<vmem>>, %arg2: memref<4x256xf32, #tpu.memory_space<vmem>>) attributes {dimension_semantics = [], scalar_prefetch = 0 : i64, scratch_operands = 0 : i64, tpu.core_type = #tpu.core_type<tc>} {
    %c0 = arith.constant 0 : index
    %c0_0 = arith.constant 0 : index
    %0 = vector.load %arg1[%c0, %c0_0] : memref<4x40xf32, #tpu.memory_space<vmem>>, vector<4x40xf32>
    %c0_1 = arith.constant 0 : index
    %c0_2 = arith.constant 0 : index
    %1 = vector.load %arg0[%c0_1, %c0_2] : memref<40x256xf32, #tpu.memory_space<vmem>>, vector<40x256xf32>
    %cst = arith.constant dense<0.000000e+00> : vector<4x256xf32>
    %2 = tpu.matmul %0, %1, %cst {dimension_numbers = #tpu.dot_dimension_numbers<[1], [0], [0], [1], [0, 0, 1, 1], [], []>} : vector<4x40xf32>, vector<40x256xf32>, vector<4x256xf32> -> vector<4x256xf32>
    %c0_3 = arith.constant 0 : index
    %c0_4 = arith.constant 0 : index
    %3 = vector.load %arg0[%c0_3, %c0_4] : memref<40x256xf32, #tpu.memory_space<vmem>>, vector<4x256xf32>
    %4 = arith.addf %2, %3 : vector<4x256xf32>
    %cst_5 = arith.constant 0.000000e+00 : f32
    %5 = vector.broadcast %cst_5 : f32 to vector<4x256xf32>
    %6 = arith.maximumf %4, %5 : vector<4x256xf32>
    %c0_6 = arith.constant 0 : index
    %c0_7 = arith.constant 0 : index
    %7 = vector.load %arg2[%c0_6, %c0_7] : memref<4x256xf32, #tpu.memory_space<vmem>>, vector<4x256xf32>
    tpu.vector_store %arg2[%c0_6, %c0_7], %6 {strides = array<i32>} : memref<4x256xf32, #tpu.memory_space<vmem>>, vector<4x256xf32>,
    return
  }
}

</mosaic_0001>

<bundles_post_ra>
// kernel: tpu_custom_call.1
= control target key start
LH: loop header
LB: loop body
LE: loop exit
PB: predicated region body
PF: predicated region fallthrough
CT: control target
= control target key end

     0   :  { %7 = vsyncpa [#allocation3], 0  ;;  %s240_s0 = inlined_call_operand.hbm [shape: f32[40,256], index: 0, kind: input, shape index: {}]   ;;  %s241_s1 = inlined_call_operand.hbm [shape: f32[4,40], index: 1, kind: input, shape index: {}]   ;;  %s242_s2 = inlined_call_operand.hbm [shape: f32[4,256], index: 2, kind: output, shape index: {}]  }
   0x1   :  { %8 = vsyncpa [#allocation6], 0 }
   0x2   :  { %9 = vsyncpa [#allocation4], 0  ;;  %s14_s11 = sshll.u32 %s240_s0, 4  ;;  %s211_s12 = smov [#allocation2]   ;;  %s15_s11 = int_to_ptr.hbm [resolvable:$true] %s14_s11 }
   0x3   :  { %s16_s13 = sshll.u32 %s211_s12, 4  ;;  %s28_s16 = sshll.u32 %s241_s1, 4  ;;  %s17_s13 = int_to_ptr.vmem [resolvable:$true] %s16_s13  ;;  %s29_s16 = int_to_ptr.hbm [resolvable:$true] %s28_s16 }
   0x4   :  { %s212_s17 = smov 256   ;;  %s213_s18 = smov 16  }
   0x5   :  { %22 = dma.hbm_to_vmem [thread:$0]  %s15_s11, 1280, %s17_s13, [#allocation3], %s212_s17, %s212_s17, %s213_s18  }
   0x6   :  { %s214_s19 = smov [#allocation5]  }
   0x7   :  { %s30_s20 = sshll.u32 %s214_s19, 4  ;;  %s31_s20 = int_to_ptr.vmem [resolvable:$true] %s30_s20 }
   0x8   :  { %33 = dma.hbm_to_vmem [thread:$0]  %s29_s16, 64, %s31_s20, [#allocation6]  }
   0x9   :  { %205 = dma.done.wait [#allocation3], 1280  }
   0xa   :  { %206 = vsyncadd [#allocation3], 4294966016 }
   0xb   :  { %207 = dma.done.wait [#allocation6], 64  }
   0xc   :  { %208 = vsyncadd [#allocation6], 4294967232  ;;  %v52_v0 = vld [vmem:[#allocation2 + $0x48] sm:$0xff]  ;;  %v51_v1 = vld [vmem:[#allocation2 + $0x40] sm:$0xff]  ;;  %vm55_vm0 = vcmask 326656   ;;  %s215_s0 = smov [#allocation7]  }
   0xd   :  { %v50_v2 = vld [vmem:[#allocation2 + $0x38] sm:$0xff]  ;;  %90 = vmatpush.msra.mxu1 %v52_v0  ;;  %70 = vmatpush.msra.mxu0 %v51_v1  ;;  %v49_v3 = vld [vmem:[#allocation2 + $0x30] sm:$0xff]  ;;  %v48_v4 = vld [vmem:[#allocation2 + $0x28] sm:$0xff]  ;;  %s113_s1 = sshll.u32 %s215_s0, 4  ;;  %s115_s23 = sshll.u32 %s242_s2, 4  ;;  %vm104_vm1 = vcmask 1043456   ;;  %s114_s1 = int_to_ptr.vmem [resolvable:$true] %s113_s1  ;;  %s116_s23 = int_to_ptr.hbm [resolvable:$true] %s115_s23 }
   0xe   :  { %v47_v5 = vld [vmem:[#allocation2 + $0x20] sm:$0xff]  ;;  %v46_v6 = vld [vmem:[#allocation2 + $0x18] sm:$0xff]  ;;  %v45_v7 = vld [vmem:[#allocation2 + $0x10] sm:$0xff] }
   0xf   :  { %91 = vmatpush.msra.mxu1 %v50_v2  ;;  %71 = vmatpush.msra.mxu0 %v49_v3  ;;  %v44_v8 = vld [vmem:[#allocation2 + $0x8] sm:$0xff]  ;;  %v43_v9 = vld [vmem:[#allocation2] sm:$0xff]  ;;  %v42_v10 = vld [vmem:[#allocation5] sm:$0xf] }
  0x10   :  { %v54_v11 = vld [vmem:[#allocation2 + $0x8] sm:$0xf]  ;;  %v53_v12 = vld [vmem:[#allocation2] sm:$0xf] }
  0x11   :  { %92 = vmatpush.msra.mxu1 %v48_v4  ;;  %72 = vmatpush.msra.mxu0 %v47_v5 }
  0x13   :  { %93 = vmatpush.msra.mxu1 %v46_v6  ;;  %73 = vmatpush.msra.mxu0 %v45_v7 }
  0x15   :  { %94 = vmatpush.msra.mxu1 %v44_v8  ;;  %74 = vmatpush.msra.mxu0 %v43_v9 }
  0x16   :  { %127 = vmatmul.msk.f32.vlgmr.msra.gmra.mxu1 %vm55_vm0, %v42_v10  ;;  %126 = vmatmul.msk.f32.vlgmr.msra.gmra.mxu0 %vm55_vm0, %v42_v10 }
  0x93   :  { %v96_v13 = vpop.f32.mrf.mxu1  ;;  %v76_v14 = vpop.f32.mrf.mxu0 }
  0x94   :  { %v97_v15 = vadd.f32 %v96_v13, %v54_v11  ;;  %v77_v16 = vadd.f32 %v76_v14, %v53_v12 }
  0x96   :  { %v100_v17 = vmax.f32 %v97_v15, 0.0  ;;  %v99_v18 = vmax.f32 %v77_v16, 0.0 }
  0x98   :  { %v103_v19 = vrot.slane %v100_v17, 4 }
  0x9a   :  { %v105_v20 = vsel %vm104_vm1, %v99_v18, %v103_v19 }
  0x9b   :  { %107 = vst [vmem:[#allocation7] sm:$0xff] %v105_v20 }
  0x9c   :  { %118 = dma.vmem_to_hbm [thread:$0]  %s114_s1, 128, %s116_s23, [#allocation4]  }
  0x9d   :  { %209 = dma.done.wait [#allocation4], 128  }
  0x9e   :  { %210 = vsyncadd [#allocation4], 4294967168 }
  0x9f   :  { %123 = vsyncpa [#allocation3], 1 }
  0xa0   :  { %124 = vsyncpa [#allocation6], 1 }
  0xa1   :  { %125 = vsyncpa [#allocation4], 1 }

</bundles_post_ra>
